<compile_context>
chip_gen: v7x
topology: tpu7x:2x2x1
jax: 0.10.0
libtpu: 0.0.40
codegen_flags: <defaults>
</compile_context>

<pallas_src>
import numpy as np

import jax
import jax.numpy as jnp
from jax.experimental import pallas as pl
from jax.experimental.pallas import tpu as pltpu


# ----------------------------------------------------------------------------
# Kernel 1: parameter branch (commn_linear -> ReLU, then scale / rotation / translation heads)
# ----------------------------------------------------------------------------
def _adaat_param_kernel(p_ref, wc_ref, bc_ref, ws_ref, bs_ref, wr_ref, br_ref,
                        wt_ref, bt_ref, cos_ref, sin_ref, scale_ref, trans_ref):
    h = jnp.dot(p_ref[...], wc_ref[...], preferred_element_type=jnp.float32) + bc_ref[...]
    h = jnp.maximum(h, 0.0)                                    # Linear + ReLU
    s = jnp.dot(h, ws_ref[...], preferred_element_type=jnp.float32) + bs_ref[...]
    scale_ref[...] = 2.0 / (1.0 + jnp.exp(-s))                 # sigmoid(x) * 2
    r = jnp.dot(h, wr_ref[...], preferred_element_type=jnp.float32) + br_ref[...]
    ang = jnp.tanh(r) * 3.14159                                # tanh(x) * pi (module uses 3.14159)
    cos_ref[...] = jnp.cos(ang)                                # EUP; saves XLA glue ops later
    sin_ref[...] = jnp.sin(ang)
    t = jnp.dot(h, wt_ref[...], preferred_element_type=jnp.float32) + bt_ref[...]
    trans_ref[...] = jnp.tanh(t)


def adaat_params_pallas(para_code, params):
    wc, bc, ws, bs, wr, br, wt, bt = params
    B = para_code.shape[0]
    C = ws.shape[1]
    return pl.pallas_call(
        _adaat_param_kernel,
        out_shape=(
            jax.ShapeDtypeStruct((B, C), jnp.float32),         # cos(angle)
            jax.ShapeDtypeStruct((B, C), jnp.float32),         # sin(angle)
            jax.ShapeDtypeStruct((B, C), jnp.float32),         # scale (already *2)
            jax.ShapeDtypeStruct((B, 2 * C), jnp.float32),     # translation (tanh)
        ),
    )(para_code, wc, bc, ws, bs, wr, br, wt, bt)


# ----------------------------------------------------------------------------
# Kernel 2: per-(batch, channel-block) affine warp + trilinear grid_sample
#           (zeros padding, align_corners=False).  CK channels per grid step.
# ----------------------------------------------------------------------------
def _adaat_warp_kernel(aff_ref, zidx_ref, x0_ref, y0_ref, qx_ref, qy_ref, f_ref, o_ref):
    b = pl.program_id(0)
    j = pl.program_id(1)                       # channel-block index
    CK = o_ref.shape[1]                        # channels per grid step (static)
    C = CK * pl.num_programs(1)
    H = f_ref.shape[2]
    W = f_ref.shape[3]

    # constant tables (each DMA'd once: their index_map always returns block 0)
    x0 = x0_ref[...]                           # (1, HW) base x in [-1, 1] for pixel n = i*W + j
    y0 = y0_ref[...]                           # (1, HW) base y in [-1, 1]
    qx = qx_ref[...]                           # (W, HW) source-column index q
    qy = qy_ref[...]                           # (H, HW) source-row index p

    # Statically unrolled channel loop (== lax.fori_loop(..., unroll=True)); static sublane
    # indices keep the per-channel output stores dense.
    for c in range(CK):
        ch = j * CK + c
        base = (b * C + ch) * 8
        # packed per-(b, ch) scalars in SMEM: [cos, sin, scale, tx, ty, w_zlo, w_zhi, pad]
        cos_v = aff_ref[base + 0]
        sin_v = aff_ref[base + 1]
        scl_v = aff_ref[base + 2]
        tx_v = aff_ref[base + 3]
        ty_v = aff_ref[base + 4]
        w0_v = aff_ref[base + 5]
        w1_v = aff_ref[base + 6]
        zlo = zidx_ref[2 * ch + 0]
        zhi = zidx_ref[2 * ch + 1]

        # per-channel affine transform: [x'; y'] = R @ [x; y] * scale + t   (VPU, scalar bcast)
        xt = (cos_v * x0 - sin_v * y0) * scl_v + tx_v
        yt = (sin_v * x0 + cos_v * y0) * scl_v + ty_v
        # unnormalize to pixel coords (grid_sample align_corners=False)
        xu = ((xt + 1.0) * W - 1.0) * 0.5
        yu = ((yt + 1.0) * H - 1.0) * 0.5

        # triangular interpolation weights; they vanish outside the image -> 'zeros' padding
        kx = jnp.maximum(0.0, 1.0 - jnp.abs(xu - qx))          # (W, HW)
        ky = jnp.maximum(0.0, 1.0 - jnp.abs(yu - qy))          # (H, HW)

        # trilinear z interpolation: blend the two bracketing slices of the resident volume
        s_blend = w0_v * f_ref[0, zlo, :, :] + w1_v * f_ref[0, zhi, :, :]   # (H, W)

        # gather-free bilinear sample:  out[n] = sum_p ky[p, n] * sum_q S[p, q] * kx[q, n]
        # bf16 MXU operands, f32 accumulation.
        tmp = jnp.dot(s_blend.astype(jnp.bfloat16), kx.astype(jnp.bfloat16),
                      preferred_element_type=jnp.float32)                   # (H, HW)
        o_ref[0, c:c + 1, :] = jnp.sum(ky * tmp, axis=0, keepdims=True)     # (1, HW)


def _z_blend_schedule(depth):
    """Static z-sampling schedule: which two slices each output channel blends and with
    what weights (F.grid_sample, align_corners=False, zeros padding)."""
    k = np.arange(depth)
    z_norm = 2.0 * k / (depth - 1) - 1.0
    z_un = ((z_norm + 1.0) * depth - 1.0) * 0.5
    z0 = np.floor(z_un).astype(np.int64)
    wz = (z_un - z0).astype(np.float32)
    valid0 = (z0 >= 0) & (z0 <= depth - 1)
    valid1 = (z0 + 1 >= 0) & (z0 + 1 <= depth - 1)
    w0 = np.where(valid0, 1.0 - wz, 0.0).astype(np.float32)
    w1 = np.where(valid1, wz, 0.0).astype(np.float32)
    zidx = np.stack([np.clip(z0, 0, depth - 1), np.clip(z0 + 1, 0, depth - 1)],
                    axis=1).astype(np.int32)                                # [depth, 2]
    return zidx, w0, w1


def _pick_channel_block(C, ck_max=16):
    """Largest legal channel block: full C if small, else a multiple of 8 that divides C
    (keeps the (8,128) output-block constraint satisfied)."""
    if C <= ck_max:
        return C
    start = ck_max - (ck_max % 8)
    for ck in range(start, 7, -8):
        if C % ck == 0:
            return ck
    return C


def adaat_forward(feature_map, para_code, params, ck_max=16):
    """feature_map: [B, D, H, W], para_code: [B, para_ch] -> [B, D, H, W]"""
    B, D, H, W = feature_map.shape
    cosv, sinv, scale2, trans = adaat_params_pallas(para_code, params)
    C = scale2.shape[1]
    assert C == D, "AdaAT requires feature_ch == feature_map channel dim"
    HW = H * W
    CK = _pick_channel_block(C, ck_max)

    # packed per-(b, ch) scalar table for SMEM: [cos, sin, scale, tx, ty, w_zlo, w_zhi, pad]
    t = trans.reshape(B, C, 2)
    zidx, w0, w1 = _z_blend_schedule(D)
    w0b = jnp.broadcast_to(jnp.asarray(w0)[None, :], (B, C))
    w1b = jnp.broadcast_to(jnp.asarray(w1)[None, :], (B, C))
    pad = jnp.zeros((B, C), jnp.float32)
    aff = jnp.stack([cosv, sinv, scale2, t[..., 0], t[..., 1], w0b, w1b, pad], axis=-1)
    aff_flat = aff.reshape(-1).astype(jnp.float32)             # [B*C*8] (SMEM)
    zidx_flat = jnp.asarray(zidx.reshape(-1), jnp.int32)       # [2*C]   (SMEM, static)

    # constant coordinate tables (depend only on (H, W)) -> hoisted out of the kernel
    xn = 2.0 * np.arange(W, dtype=np.float32) / (W - 1) - 1.0
    yn = 2.0 * np.arange(H, dtype=np.float32) / (H - 1) - 1.0
    x0 = jnp.asarray(np.tile(xn, H)[None, :])                  # (1, HW): x of pixel n = i*W + j
    y0 = jnp.asarray(np.repeat(yn, W)[None, :])                # (1, HW): y of pixel n
    qx = jnp.asarray(np.broadcast_to(np.arange(W, dtype=np.float32)[:, None], (W, HW)).copy())
    qy = jnp.asarray(np.broadcast_to(np.arange(H, dtype=np.float32)[:, None], (H, HW)).copy())

    # explicit VMEM budget: resident volume + output block + constants (double-buffered)
    # + per-channel temporaries, with headroom; capped at 64 MiB so it is valid on v7x too.
    est_bytes = 4 * (2 * D * H * W + 2 * CK * HW + 2 * (2 * HW + (H + W) * HW)
                     + 6 * (H + W) * HW)
    vmem_limit = int(min(64 * 1024 * 1024, max(8 * 1024 * 1024, 2 * est_bytes)))

    out = pl.pallas_call(
        _adaat_warp_kernel,
        out_shape=jax.ShapeDtypeStruct((B, C, HW), jnp.float32),
        grid_spec=pltpu.PrefetchScalarGridSpec(
            num_scalar_prefetch=0,
            grid=(B, C // CK),
            in_specs=[
                pl.BlockSpec(memory_space=pltpu.MemorySpace.SMEM),     # aff_flat
                pl.BlockSpec(memory_space=pltpu.MemorySpace.SMEM),     # zidx_flat
                pl.BlockSpec((1, HW), lambda b, j: (0, 0)),            # x0 (fetched once)
                pl.BlockSpec((1, HW), lambda b, j: (0, 0)),            # y0 (fetched once)
                pl.BlockSpec((W, HW), lambda b, j: (0, 0)),            # qx (fetched once)
                pl.BlockSpec((H, HW), lambda b, j: (0, 0)),            # qy (fetched once)
                # per-batch resident feature volume: same block for every channel step
                pl.BlockSpec((1, D, H, W), lambda b, j: (b, 0, 0, 0)),
            ],
            out_specs=pl.BlockSpec((1, CK, HW), lambda b, j: (b, j, 0)),
        ),
        compiler_params=pltpu.CompilerParams(
            dimension_semantics=("parallel", "parallel"),
            vmem_limit_bytes=vmem_limit),
    )(aff_flat, zidx_flat, x0, y0, qx, qy, feature_map)
    return out.reshape(B, C, H, W)


# ----------------------------------------------------------------------------
# Pure-JAX references for correctness checking
# ----------------------------------------------------------------------------
def mlp_ref(para_code, params):
    wc, bc, ws, bs, wr, br, wt, bt = params
    h = jnp.maximum(para_code @ wc + bc, 0.0)
    scale2 = jax.nn.sigmoid(h @ ws + bs) * 2.0
    angle = jnp.tanh(h @ wr + br) * 3.14159
    trans = jnp.tanh(h @ wt + bt)
    return jnp.cos(angle), jnp.sin(angle), scale2, trans


def build_grid(B, D, H, W, cosv, sinv, scale2, trans):
    C = D
    t = trans.reshape(B, C, 2)
    xs = 2.0 * jnp.arange(W, dtype=jnp.float32) / (W - 1) - 1.0
    ys = 2.0 * jnp.arange(H, dtype=jnp.float32) / (H - 1) - 1.0
    zs = 2.0 * jnp.arange(D, dtype=jnp.float32) / (D - 1) - 1.0
    gx = jnp.broadcast_to(xs[None, None, None, :], (B, C, H, W))
    gy = jnp.broadcast_to(ys[None, None, :, None], (B, C, H, W))
    gz = jnp.broadcast_to(zs[None, :, None, None], (B, C, H, W))
    cb = cosv[:, :, None, None]
    sb = sinv[:, :, None, None]
    sc = scale2[:, :, None, None]
    tx = t[..., 0][:, :, None, None]
    ty = t[..., 1][:, :, None, None]
    xt = (cb * gx - sb * gy) * sc + tx
    yt = (sb * gx + cb * gy) * sc + ty
    return jnp.stack([xt, yt, gz], axis=-1)                    # [B, D, H, W, 3] (x, y, z)


def grid_sample_3d_ref(vol, grid):
    """Trilinear grid_sample, padding_mode='zeros', align_corners=False (PyTorch defaults)."""
    B, D, H, W = vol.shape
    xu = ((grid[..., 0] + 1.0) * W - 1.0) * 0.5
    yu = ((grid[..., 1] + 1.0) * H - 1.0) * 0.5
    zu = ((grid[..., 2] + 1.0) * D - 1.0) * 0.5
    x0f, y0f, z0f = jnp.floor(xu), jnp.floor(yu), jnp.floor(zu)
    wx1, wy1, wz1 = xu - x0f, yu - y0f, zu - z0f
    wx0, wy0, wz0 = 1.0 - wx1, 1.0 - wy1, 1.0 - wz1
    bidx = jnp.arange(B).reshape(B, 1, 1, 1)

    def tap(zf, yf, xf, w):
        zi, yi, xi = zf.astype(jnp.int32), yf.astype(jnp.int32), xf.astype(jnp.int32)
        valid = ((xi >= 0) & (xi < W) & (yi >= 0) & (yi < H) & (zi >= 0) & (zi < D))
        v = vol[bidx, jnp.clip(zi, 0, D - 1), jnp.clip(yi, 0, H - 1), jnp.clip(xi, 0, W - 1)]
        return jnp.where(valid, v, 0.0) * w

    out = 0.0
    for zf, wz in ((z0f, wz0), (z0f + 1.0, wz1)):
        for yf, wy in ((y0f, wy0), (y0f + 1.0, wy1)):
            for xf, wx in ((x0f, wx0), (x0f + 1.0, wx1)):
                out = out + tap(zf, yf, xf, wz * wy * wx)
    return out


def init_params(key, para_ch, feature_ch):
    ks = jax.random.split(key, 8)

    def lin(kw, kb, fin, fout):
        return (0.3 * jax.random.normal(kw, (fin, fout), jnp.float32),
                0.1 * jax.random.normal(kb, (1, fout), jnp.float32))

    wc, bc = lin(ks[0], ks[1], para_ch, para_ch)
    ws, bs = lin(ks[2], ks[3], para_ch, feature_ch)
    wr, br = lin(ks[4], ks[5], para_ch, feature_ch)
    wt, bt = lin(ks[6], ks[7], para_ch, 2 * feature_ch)
    return (wc, bc, ws, bs, wr, br, wt, bt)


if __name__ == "__main__":
    B, para_ch = 2, 32
    D = feature_ch = 4           # feature_map channel dim == feature_ch (as AdaAT assumes)
    H = W = 16

    key = jax.random.PRNGKey(0)
    kp, kf, kc = jax.random.split(key, 3)
    params = init_params(kp, para_ch, feature_ch)
    feature_map = jax.random.normal(kf, (B, D, H, W), jnp.float32)
    para_code = jax.random.normal(kc, (B, para_ch), jnp.float32)

    out = adaat_forward(feature_map, para_code, params)
    out = jax.block_until_ready(out)
    assert out.shape == (B, D, H, W)

    # Stage 1: parameter-branch kernel vs pure-JAX MLP (tolerances allow for possible bf16
    # MXU passes of f32 matmuls on either side).
    c_k, s_k, sc_k, t_k = adaat_params_pallas(para_code, params)
    c_r, s_r, sc_r, t_r = mlp_ref(para_code, params)
    for got, want in ((c_k, c_r), (s_k, s_r), (sc_k, sc_r), (t_k, t_r)):
        assert jnp.allclose(got, want, atol=5e-2, rtol=5e-2)

    # Stage 2: full Pallas output vs JAX trilinear grid_sample built from the *same*
    # transform params (so tiny matmul-precision differences in the MLP are not amplified
    # into sampling-coordinate shifts).  The warp kernel uses bf16 MXU operands with f32
    # accumulation, well inside this tolerance.
    ref = grid_sample_3d_ref(feature_map, build_grid(B, D, H, W, c_k, s_k, sc_k, t_k))
    assert jnp.allclose(out, ref, atol=5e-2, rtol=5e-2)

    print("KERNEL_OK")
</pallas_src>

<mosaic_0001>
module attributes {stable_mosaic.version = 11 : i64} {
  func.func @_adaat_param_kernel(%arg0: memref<2x32xf32, #tpu.memory_space<vmem>>, %arg1: memref<32x32xf32, #tpu.memory_space<vmem>>, %arg2: memref<1x32xf32, #tpu.memory_space<vmem>>, %arg3: memref<32x4xf32, #tpu.memory_space<vmem>>, %arg4: memref<1x4xf32, #tpu.memory_space<vmem>>, %arg5: memref<32x4xf32, #tpu.memory_space<vmem>>, %arg6: memref<1x4xf32, #tpu.memory_space<vmem>>, %arg7: memref<32x8xf32, #tpu.memory_space<vmem>>, %arg8: memref<1x8xf32, #tpu.memory_space<vmem>>, %arg9: memref<2x4xf32, #tpu.memory_space<vmem>>, %arg10: memref<2x4xf32, #tpu.memory_space<vmem>>, %arg11: memref<2x4xf32, #tpu.memory_space<vmem>>, %arg12: memref<2x8xf32, #tpu.memory_space<vmem>>) attributes {dimension_semantics = [], scalar_prefetch = 0 : i64, scratch_operands = 0 : i64, tpu.core_type = #tpu.core_type<tc>} {
    %c0 = arith.constant 0 : index
    %c0_0 = arith.constant 0 : index
    %0 = vector.load %arg0[%c0, %c0_0] : memref<2x32xf32, #tpu.memory_space<vmem>>, vector<2x32xf32>
    %c0_1 = arith.constant 0 : index
    %c0_2 = arith.constant 0 : index
    %1 = vector.load %arg1[%c0_1, %c0_2] : memref<32x32xf32, #tpu.memory_space<vmem>>, vector<32x32xf32>
    %cst = arith.constant dense<0.000000e+00> : vector<2x32xf32>
    %2 = tpu.matmul %0, %1, %cst {dimension_numbers = #tpu.dot_dimension_numbers<[1], [0], [0], [1], [0, 0, 1, 1], [], []>} : vector<2x32xf32>, vector<32x32xf32>, vector<2x32xf32> -> vector<2x32xf32>
    %c0_3 = arith.constant 0 : index
    %c0_4 = arith.constant 0 : index
    %3 = vector.load %arg2[%c0_3, %c0_4] : memref<1x32xf32, #tpu.memory_space<vmem>>, vector<1x32xf32>
    %4 = vector.broadcast %3 : vector<1x32xf32> to vector<2x32xf32>
    %5 = arith.addf %2, %4 : vector<2x32xf32>
    %cst_5 = arith.constant 0.000000e+00 : f32
    %6 = vector.broadcast %cst_5 : f32 to vector<2x32xf32>
    %7 = arith.maximumf %5, %6 : vector<2x32xf32>
    %c0_6 = arith.constant 0 : index
    %c0_7 = arith.constant 0 : index
    %8 = vector.load %arg3[%c0_6, %c0_7] : memref<32x4xf32, #tpu.memory_space<vmem>>, vector<32x4xf32>
    %cst_8 = arith.constant dense<0.000000e+00> : vector<2x4xf32>
    %9 = tpu.matmul %7, %8, %cst_8 {dimension_numbers = #tpu.dot_dimension_numbers<[1], [0], [0], [1], [0, 0, 1, 1], [], []>} : vector<2x32xf32>, vector<32x4xf32>, vector<2x4xf32> -> vector<2x4xf32>
    %c0_9 = arith.constant 0 : index
    %c0_10 = arith.constant 0 : index
    %10 = vector.load %arg4[%c0_9, %c0_10] : memref<1x4xf32, #tpu.memory_space<vmem>>, vector<1x4xf32>
    %11 = vector.broadcast %10 : vector<1x4xf32> to vector<2x4xf32>
    %12 = arith.addf %9, %11 : vector<2x4xf32>
    %cst_11 = arith.constant 0.000000e+00 : f32
    %13 = vector.broadcast %cst_11 : f32 to vector<2x4xf32>
    %14 = arith.subf %13, %12 : vector<2x4xf32>
    %15 = math.exp %14 : vector<2x4xf32>
    %cst_12 = arith.constant 1.000000e+00 : f32
    %16 = vector.broadcast %cst_12 : f32 to vector<2x4xf32>
    %17 = arith.addf %16, %15 : vector<2x4xf32>
    %cst_13 = arith.constant 2.000000e+00 : f32
    %18 = vector.broadcast %cst_13 : f32 to vector<2x4xf32>
    %19 = arith.divf %18, %17 : vector<2x4xf32>
    %c0_14 = arith.constant 0 : index
    %c0_15 = arith.constant 0 : index
    %20 = vector.load %arg11[%c0_14, %c0_15] : memref<2x4xf32, #tpu.memory_space<vmem>>, vector<2x4xf32>
    tpu.vector_store %arg11[%c0_14, %c0_15], %19 {strides = array<i32>} : memref<2x4xf32, #tpu.memory_space<vmem>>, vector<2x4xf32>,
    %c0_16 = arith.constant 0 : index
    %c0_17 = arith.constant 0 : index
    %21 = vector.load %arg5[%c0_16, %c0_17] : memref<32x4xf32, #tpu.memory_space<vmem>>, vector<32x4xf32>
    %cst_18 = arith.constant dense<0.000000e+00> : vector<2x4xf32>
    %22 = tpu.matmul %7, %21, %cst_18 {dimension_numbers = #tpu.dot_dimension_numbers<[1], [0], [0], [1], [0, 0, 1, 1], [], []>} : vector<2x32xf32>, vector<32x4xf32>, vector<2x4xf32> -> vector<2x4xf32>
    %c0_19 = arith.constant 0 : index
    %c0_20 = arith.constant 0 : index
    %23 = vector.load %arg6[%c0_19, %c0_20] : memref<1x4xf32, #tpu.memory_space<vmem>>, vector<1x4xf32>
    %24 = vector.broadcast %23 : vector<1x4xf32> to vector<2x4xf32>
    %25 = arith.addf %22, %24 : vector<2x4xf32>
    %26 = math.tanh %25 : vector<2x4xf32>
    %cst_21 = arith.constant 3.141590e+00 : f32
    %27 = vector.broadcast %cst_21 : f32 to vector<2x4xf32>
    %28 = arith.mulf %26, %27 : vector<2x4xf32>
    %29 = math.cos %28 : vector<2x4xf32>
    %c0_22 = arith.constant 0 : index
    %c0_23 = arith.constant 0 : index
    %30 = vector.load %arg9[%c0_22, %c0_23] : memref<2x4xf32, #tpu.memory_space<vmem>>, vector<2x4xf32>
    tpu.vector_store %arg9[%c0_22, %c0_23], %29 {strides = array<i32>} : memref<2x4xf32, #tpu.memory_space<vmem>>, vector<2x4xf32>,
    %31 = math.sin %28 : vector<2x4xf32>
    %c0_24 = arith.constant 0 : index
    %c0_25 = arith.constant 0 : index
    %32 = vector.load %arg10[%c0_24, %c0_25] : memref<2x4xf32, #tpu.memory_space<vmem>>, vector<2x4xf32>
    tpu.vector_store %arg10[%c0_24, %c0_25], %31 {strides = array<i32>} : memref<2x4xf32, #tpu.memory_space<vmem>>, vector<2x4xf32>,
    %c0_26 = arith.constant 0 : index
    %c0_27 = arith.constant 0 : index
    %33 = vector.load %arg7[%c0_26, %c0_27] : memref<32x8xf32, #tpu.memory_space<vmem>>, vector<32x8xf32>
    %cst_28 = arith.constant dense<0.000000e+00> : vector<2x8xf32>
    %34 = tpu.matmul %7, %33, %cst_28 {dimension_numbers = #tpu.dot_dimension_numbers<[1], [0], [0], [1], [0, 0, 1, 1], [], []>} : vector<2x32xf32>, vector<32x8xf32>, vector<2x8xf32> -> vector<2x8xf32>
    %c0_29 = arith.constant 0 : index
    %c0_30 = arith.constant 0 : index
    %35 = vector.load %arg8[%c0_29, %c0_30] : memref<1x8xf32, #tpu.memory_space<vmem>>, vector<1x8xf32>
    %36 = vector.broadcast %35 : vector<1x8xf32> to vector<2x8xf32>
    %37 = arith.addf %34, %36 : vector<2x8xf32>
    %38 = math.tanh %37 : vector<2x8xf32>
    %c0_31 = arith.constant 0 : index
    %c0_32 = arith.constant 0 : index
    %39 = vector.load %arg12[%c0_31, %c0_32] : memref<2x8xf32, #tpu.memory_space<vmem>>, vector<2x8xf32>
    tpu.vector_store %arg12[%c0_31, %c0_32], %38 {strides = array<i32>} : memref<2x8xf32, #tpu.memory_space<vmem>>, vector<2x8xf32>,
    return
  }
}

</mosaic_0001>

<bundles_post_ra>
// kernel: tpu_custom_call.1
= control target key start
LH: loop header
LB: loop body
LE: loop exit
PB: predicated region body
PF: predicated region fallthrough
CT: control target
= control target key end

     0   :  { %18 = vsyncpa [#allocation3], 0  ;;  %s1111_s0 = inlined_call_operand.vmem [shape: f32[2,32], index: 0, kind: input, shape index: {}]   ;;  %s1112_s1 = inlined_call_operand.vmem [shape: f32[32,32], index: 1, kind: input, shape index: {}]   ;;  %s1113_s2 = inlined_call_operand.vmem [shape: f32[1,32], index: 2, kind: input, shape index: {}]   ;;  %s1114_s3 = inlined_call_operand.vmem [shape: f32[32,4], index: 3, kind: input, shape index: {}]   ;;  %s1115_s4 = inlined_call_operand.vmem [shape: f32[1,4], index: 4, kind: input, shape index: {}]   ;;  %s1116_s5 = inlined_call_operand.vmem [shape: f32[32,4], index: 5, kind: input, shape index: {}]   ;;  %s1117_s6 = inlined_call_operand.vmem [shape: f32[1,4], index: 6, kind: input, shape index: {}]   ;;  %s1118_s7 = inlined_call_operand.vmem [shape: f32[32,8], index: 7, kind: input, shape index: {}]   ;;  %s1119_s8 = inlined_call_operand.vmem [shape: f32[1,8], index: 8, kind: input, shape index: {}]   ;;  %s1120_s9 = inlined_call_operand.hbm [shape: f32[2,4], index: 9, kind: output, shape index: {0}]   ;;  %s1121_s10 = inlined_call_operand.hbm [shape: f32[2,4], index: 10, kind: output, shape index: {1}]   ;;  %s1122_s11 = inlined_call_operand.hbm [shape: f32[2,4], index: 11, kind: output, shape index: {2}]   ;;  %s1123_s12 = inlined_call_operand.hbm [shape: f32[2,8], index: 12, kind: output, shape index: {3}]  }
   0x1   :  { %19 = vsyncpa [#allocation5], 0  ;;  %v40_v0 = vld [vmem:[%s1112_s1] sm:$0xff]  ;;  %v41_v1 = vld [vmem:[%s1112_s1 + $0x8] sm:$0xff]  ;;  %v876_v3 = vmov 0.0|0.0   ;;  %vm877_vm0 = vmmov 0  }
   0x2   :  { %v42_v2 = vld [vmem:[%s1112_s1 + $0x10] sm:$0xff]  ;;  %729 = vmatprep.subr.bf16.mxu0 %v876_v3  ;;  %v730_v4 = vpack.c.bf16 %v41_v1, %v40_v0  ;;  %v43_v5 = vld [vmem:[%s1112_s1 + $0x18] sm:$0xff]  ;;  %v878_v6 = vmov 0.0   ;;  %v126_v7 = vld [vmem:[%s1114_s3] sm:$0xff]  ;;  %735 = vmatprep.subr.bf16.mxu1 %v876_v3 }
   0x3   :  { %693 = vmatprep.mubr.msk.f32.mxu0 %vm877_vm0, %v878_v6  ;;  %v127_v8 = vld [vmem:[%s1114_s3 + $0x8] sm:$0xff]  ;;  %704 = vmatprep.mubr.msk.f32.mxu1 %vm877_vm0, %v878_v6  ;;  %v733_v9 = vpack.c.bf16 %v43_v5, %v42_v2 }
   0x4   :  { %731 = vmatpush3.bf16.msra.mxu0 %v730_v4  ;;  %v736_v10 = vpack.c.bf16 %v127_v8, %v126_v7 }
   0x5   :  { %20 = vsyncpa [#allocation8], 0  ;;  %732 = vmatprep.subr.bf16.mxu0 %v876_v3  ;;  %v218_v11 = vld [vmem:[%s1116_s5] sm:$0xff]  ;;  %v219_v12 = vld [vmem:[%s1116_s5 + $0x8] sm:$0xff]  ;;  %vm51_vm1 = vcmask 261120   ;;  %vm592_vm2 = vcmask 58368  }
   0x6   :  { %737 = vmatpush3.bf16.msra.mxu1 %v736_v10  ;;  %v39_v13 = vld [vmem:[%s1111_s0] sm:$0x3]  ;;  %v742_v14 = vpack.c.bf16 %v219_v12, %v218_v11  ;;  %v128_v15 = vld [vmem:[%s1114_s3 + $0x10] sm:$0xff]  ;;  %v129_v16 = vld [vmem:[%s1114_s3 + $0x18] sm:$0xff] }
   0x7   :  { %738 = vmatprep.subr.bf16.mxu1 %v876_v3  ;;  %v739_v17 = vpack.c.bf16 %v129_v16, %v128_v15  ;;  %v220_v18 = vld [vmem:[%s1116_s5 + $0x10] sm:$0xff]  ;;  %v221_v19 = vld [vmem:[%s1116_s5 + $0x18] sm:$0xff]  ;;  %v649_v21 = vld [vmem:[%s1113_s2] ss:$0 sm:$0xff] }
   0x8   :  { %734 = vmatpush3.bf16.msra.mxu0 %v733_v9  ;;  %v745_v20 = vpack.c.bf16 %v221_v19, %v220_v18  ;;  %v510_v22 = vld [vmem:[%s1118_s7] sm:$0xff]  ;;  %v511_v23 = vld [vmem:[%s1118_s7 + $0x8] sm:$0xff]  ;;  %v512_v29 = vld [vmem:[%s1118_s7 + $0x10] sm:$0xff] }
   0x9   :  { %741 = vmatprep.subr.bf16.mxu0 %v876_v3  ;;  %v748_v27 = vpack.c.bf16 %v511_v23, %v510_v22  ;;  %v513_v30 = vld [vmem:[%s1118_s7 + $0x18] sm:$0xff]  ;;  %v651_v32 = vld [vmem:[%s1115_s4] ss:$0 sm:$0xff]  ;;  %s879_s4 = smov [#allocation7]  }
   0xa   :  { %740 = vmatpush3.bf16.msra.mxu1 %v739_v17  ;;  %v751_v31 = vpack.c.bf16 %v513_v30, %v512_v29  ;;  %v653_v33 = vld [vmem:[%s1117_s6] ss:$0 sm:$0xff]  ;;  %s630_s6 = sshll.u32 %s879_s4, 4  ;;  %s631_s6 = int_to_ptr.vmem [resolvable:$true] %s630_s6 }
   0xb   :  { %694 = vmatmul.mubr.msk.f32.vlgmr.msra.gmra.mrb[0].mxu0 %vm51_vm1, %v39_v13  ;;  %747 = vmatprep.subr.bf16.mxu1 %v876_v3  ;;  %v663_v42 = vld [vmem:[%s1119_s8] ss:$0 sm:$0xff]  ;;  %s782_s8 = scalar_lea.vmem %s631_s6, 32  ;;  %p787_p1 = scmp.lt.s32.totalorder %s631_s6, %s631_s6 }
   0xc   :  { %743 = vmatpush3.bf16.msra.mxu0 %v742_v14  ;;  %715 = vmatprep.mubr.msk.f32.mxu0 %vm877_vm0, %v878_v6  ;;  %p783_p0 = scmp.ne.s32.totalorder %s631_s6, %s782_s8  ;;  %p788_p2 = scmp.lt.s32.totalorder %s782_s8, %s782_s8 }
   0xd   :  { %744 = vmatprep.subr.bf16.mxu0 %v876_v3 }
   0xe   :  { %p789_p3 = por %p788_p2, %p787_p1 }
  0x10   :  { %746 = vmatpush3.bf16.msra.mxu0 %v745_v20  ;;  %p790_p4 = pnand %p789_p3, %p783_p0 }
  0xde   :  { %v121_v24 = vpop.f32.mrb[0].mxu0 }
  0xdf   :  { %v122_v25 = vadd.f32 %v649_v21, %v121_v24  ;;  %v695_v26 = vpop.f32.mrb[1].mxu0 }
  0xe1   :  { %v125_v28 = vmax.f32 %v122_v25, 0.0 }
  0xe3   :  { %705 = vmatmul.mubr.msk.f32.vlgmr.msra.gmra.mrb[0].mxu1 %vm51_vm1, %v125_v28  ;;  %716 = vmatmul.mubr.msk.f32.vlgmr.msra.gmra.mrb[2].mxu0 %vm51_vm1, %v125_v28 }
  0xe4   :  { %749 = vmatpush3.bf16.msra.mxu1 %v748_v27  ;;  %726 = vmatprep.mubr.msk.f32.mxu1 %vm877_vm0, %v878_v6 }
  0xe5   :  { %750 = vmatprep.subr.bf16.mxu1 %v876_v3 }
  0xe8   :  { %752 = vmatpush3.bf16.msra.mxu1 %v751_v31 }
  0xeb   :  { %727 = vmatmul.mubr.msk.f32.vlgmr.msra.gmra.mrb[2].mxu1 %vm51_vm1, %v125_v28 }
 0x1b6   :  { %v206_v34 = vpop.f32.mrb[0].mxu1  ;;  %v295_v35 = vpop.f32.mrb[2].mxu0 }
 0x1b7   :  { %v207_v36 = vadd.f32 %v651_v32, %v206_v34  ;;  %v296_v37 = vadd.f32 %v653_v33, %v295_v35  ;;  %v706_v38 = vpop.f32.mrb[1].mxu1  ;;  %v717_v39 = vpop.f32.mrb[3].mxu0 }
 0x1b9   :  { %v210_v40 = vsub.f32 0.0, %v207_v36  ;;  %770 = vtanh.f32 %v296_v37 }
 0x1bb   :  { %v211_v41 = vmul.f32 1.442695, %v210_v40 }
 0x1bd   :  { %772 = vpow2.f32 %v211_v41 }
 0x1be   :  { %v587_v43 = vpop.f32.mrb[2].mxu1 }
 0x1bf   :  { %v588_v44 = vadd.f32 %v663_v42, %v587_v43  ;;  %v728_v45 = vpop.f32.mrb[3].mxu1 }
 0x1c1   :  { %774 = vtanh.f32 %v588_v44 }
 0x1c3   :  { %v771_v46 = vpop.eup %770 }
 0x1c4   :  { %v1025_v47 = vmul.f32 3.14159, %v771_v46 }
 0x1c6   :  { %v304_v48 = vand.u32 2139095040, %v1025_v47  ;;  %v301_v54 = vand.u32 2147483647, %v1025_v47 }
 0x1c7   :  { %v773_v49 = vpop.eup %772 }
 0x1c8   :  { %v213_v50 = vadd.f32 1.0, %v773_v49  ;;  %v305_v51 = vshrl.u32 %v304_v48, 23 }
 0x1ca   :  { %776 = vrcp.f32 %v213_v50  ;;  %v655_v52 = vadd.s32 4294967169, %v305_v51 }
 0x1cb   :  { %v775_v53 = vpop.eup %774 }
 0x1cc   :  { %v311_v55 = vadd.s32 1, %v655_v52  ;;  %593 = vst.msk [vmem:[#allocation7] sm:$0x3] %vm592_vm2, %v775_v53 }
 0x1cd   :  { %793 = shalt.err (!%p790_p4)
}
 0x1ce   :  { %s794_s22 = scalar_lea.hbm %s1123_s12, 32 }
 0x1cf   :  { %p795_p5 = scmp.ne.s32.totalorder %s1123_s12, %s794_s22  ;;  %p798_p6 = scmp.lt.u32.totalorder %s794_s22, %s1123_s12 }
 0x1d1   :  { %p800_p7 = pnand %p798_p6, %p795_p5 }
 0x1d3   :  { %803 = shalt.err (!%p800_p7)
}
 0x1d4   :  { %633 = dma.vmem_to_hbm [thread:$0]  %s631_s6, 32, %s1123_s12, [#allocation8]   ;;  %vm312_vm3 = vcmp.gt.s32.totalorder %v311_v55, 0  ;;  %v308_v57 = vand.u32 8388607, %v301_v54  ;;  %vm216_vm4 = vcmask 25600   ;;  %v777_v2 = vpop.eup %776 }
 0x1d5   :  { %v313_v56 = vsel %vm312_vm3, %v311_v55, 0  ;;  %v880_v62 = vmov 683565275   ;;  %v881_v0 = vmov 2475754826   ;;  %v215_v18 = vmul.f32 2.0, %v777_v2 }
 0x1d6   :  { %v315_v58 = vand.u32 31, %v313_v56  ;;  %v314_v60 = vshrl.u32 %v313_v56, 5  ;;  %v309_v61 = vor.u32 8388608, %v308_v57  ;;  %v882_v4 = vmov 2131351028   ;;  %s886_s12 = smov [#allocation4]  }
 0x1d7   :  { %v883_v7 = vmov 2102212464   ;;  %v884_v10 = vmov 920167782   ;;  %v885_v13 = vmov 1326507024   ;;  %vm393_vm3 = vweird.f32 %v1025_v47 }
 0x1d8   :  { %v316_v59 = vsub.s32 32, %v315_v58  ;;  %v318_v63 = vshll.u32 %v880_v62, %v315_v58  ;;  %v321_v1 = vshll.u32 %v881_v0, %v315_v58  ;;  %v324_v6 = vshll.u32 %v882_v4, %v315_v58  ;;  %217 = vst.msk [vmem:[#allocation6] sm:$0x3] %vm216_vm4, %v215_v18  ;;  %s610_s28 = sshll.u32 %s886_s12, 4  ;;  %s887_s29 = smov [#allocation2]   ;;  %s611_s28 = int_to_ptr.vmem [resolvable:$true] %s610_s28 }
 0x1d9   :  { %v327_v9 = vshll.u32 %v883_v7, %v315_v58  ;;  %v330_v12 = vshll.u32 %v884_v10, %v315_v58  ;;  %vm333_vm5 = vcmp.lt.s32.totalorder %v314_v60, 1  ;;  %vm336_vm6 = vcmp.lt.s32.totalorder %v314_v60, 4  ;;  %s600_s30 = sshll.u32 %s887_s29, 4  ;;  %s888_s3 = smov [#allocation6]   ;;  %s1059_s30 = int_to_ptr.vmem [resolvable:$true] %s600_s30 }
 0x1da   :  { %v319_v3 = vshrl.u32 %v881_v0, %v316_v59  ;;  %v322_v5 = vshrl.u32 %v882_v4, %v316_v59  ;;  %v325_v8 = vshrl.u32 %v883_v7, %v316_v59  ;;  %v328_v11 = vshrl.u32 %v884_v10, %v316_v59  ;;  %s620_s13 = sshll.u32 %s888_s3, 4  ;;  %s804_s5 = scalar_lea.vmem %s611_s28, 32  ;;  %s1063_s13 = int_to_ptr.vmem [resolvable:$true] %s620_s13 }
 0x1db   :  { %v331_v14 = vshrl.u32 %v885_v13, %v316_v59  ;;  %v317_v24 = vshrl.u32 %v880_v62, %v316_v59  ;;  %vm335_vm7 = vcmp.lt.s32.totalorder %v314_v60, 3  ;;  %vm334_vm8 = vcmp.lt.s32.totalorder %v314_v60, 2  ;;  %p805_p8 = scmp.ne.s32.totalorder %s611_s28, %s804_s5  ;;  %p809_p9 = scmp.lt.s32.totalorder %s611_s28, %s611_s28 }
 0x1dc   :  { %v320_v15 = vor.u32 %v319_v3, %v318_v63  ;;  %v323_v16 = vor.u32 %v322_v5, %v321_v1  ;;  %v326_v17 = vor.u32 %v325_v8, %v324_v6  ;;  %v329_v19 = vor.u32 %v328_v11, %v327_v9  ;;  %p810_p10 = scmp.lt.s32.totalorder %s804_s5, %s804_s5 }
 0x1dd   :  { %v332_v20 = vor.u32 %v331_v14, %v330_v12  ;;  %v349_v29 = vshll.u32 %v309_v61, 8  ;;  %vm303_vm11 = vcmp.lt.s32.totalorder %v1025_v47, 0  ;;  %vm302_vm12 = vcmp.le.f32.partialorder %v301_v54, 0.7853982 }
 0x1de   :  { %v338_v21 = vsel %vm336_vm6, %v326_v17, 2102212464  ;;  %v341_v22 = vsel %vm333_vm5, %v320_v15, %v323_v16  ;;  %v345_v23 = vsel %vm333_vm5, %v323_v16, %v326_v17  ;;  %v342_v25 = vsel %vm336_vm6, %v329_v19, 920167782  ;;  %p811_p11 = por %p810_p10, %p809_p9 }
 0x1df   :  { %v346_v26 = vsel %vm336_vm6, %v332_v20, 1326507024  ;;  %v343_v27 = vsel %vm335_vm7, %v326_v17, %v342_v25  ;;  %v337_v30 = vsel %vm333_vm5, %v317_v24, %v320_v15  ;;  %v339_v31 = vsel %vm335_vm7, %v323_v16, %v338_v21 }
 0x1e0   :  { %v347_v28 = vsel %vm335_vm7, %v329_v19, %v346_v26  ;;  %v344_v32 = vsel %vm334_vm8, %v341_v22, %v343_v27  ;;  %v340_v38 = vsel %vm334_vm8, %v337_v30, %v339_v31  ;;  %p812_p12 = pnand %p811_p11, %p805_p8 }
 0x1e1   :  { %v348_v33 = vsel %vm334_vm8, %v345_v23, %v347_v28  ;;  %v1047_v36 = vmul.u32.u64.low %v349_v29, %v344_v32  ;;  %v1048_v37 = vmul.u32.u64.high %v349_v29, %v344_v32, %v1047_v36  ;;  %v356_v40 = vmul.u32 %v349_v29, %v340_v38 }
 0x1e2   :  { %v1044_v34 = vmul.u32.u64.low %v349_v29, %v348_v33  ;;  %v1045_v35 = vmul.u32.u64.high %v349_v29, %v348_v33, %v1044_v34 }
 0x1e3   :  { %v359_v39 = vadd.s32 1, %v1048_v37 }
 0x1e4   :  { %vm358_vm9 = vc.u32 %v1045_v35, %v1047_v36  ;;  %v357_v53 = vadd.s32 %v1047_v36, %v1045_v35 }
 0x1e5   :  { %v360_v41 = vsel %vm358_vm9, %v359_v39, %v1048_v37 }
 0x1e6   :  { %v361_v42 = vadd.s32 %v360_v41, %v356_v40 }
 0x1e8   :  { %v362_v43 = vadd.s32 536870912, %v361_v42 }
 0x1ea   :  { %v363_v44 = vshrl.u32 %v362_v43, 30 }
 0x1ec   :  { %v364_v45 = vshll.u32 %v363_v44, 30  ;;  %v387_v2 = vsub.s32 4, %v363_v44 }
 0x1ee   :  { %v365_v46 = vsub.s32 %v361_v42, %v364_v45  ;;  %v388_v5 = vsel %vm303_vm11, %v387_v2, %v363_v44 }
 0x1ef   :  { %v390_v7 = vsel %vm302_vm12, 0, %v388_v5 }
 0x1f0   :  { %v367_v48 = vsub.s32 0, %v365_v46  ;;  %v498_v8 = vadd.s32 3, %v390_v7  ;;  %v394_v10 = vand.u32 3, %v390_v7 }
 0x1f2   :  { %v656_v49 = vmin.u32 %v367_v48, %v365_v46  ;;  %v499_v9 = vand.u32 3, %v498_v8  ;;  %vm399_vm14 = vcmp.eq.s32.totalorder %v394_v10, 2  ;;  %vm396_vm0 = vcmp.eq.s32.totalorder %v394_v10, 0 }
 0x1f3   :  { %vm395_vm2 = vcmp.lt.s32.totalorder %v394_v10, 2 }
 0x1f4   :  { %v369_v50 = vclz %v656_v49  ;;  %vm504_vm13 = vcmp.eq.s32.totalorder %v499_v9, 2  ;;  %vm501_vm15 = vcmp.eq.s32.totalorder %v499_v9, 0  ;;  %vm500_vm1 = vcmp.lt.s32.totalorder %v499_v9, 2 }
 0x1f6   :  { %v657_v51 = vadd.s32 4294967294, %v369_v50 }
 0x1f8   :  { %vm658_vm10 = vcmp.lt.s32.totalorder %v657_v51, 0 }
 0x1f9   :  { %v372_v52 = vsel %vm658_vm10, 0, %v657_v51 }
 0x1fa   :  { %v373_v55 = vsub.s32 32, %v372_v52  ;;  %v377_v56 = vsub.s32 4294967266, %v372_v52  ;;  %v374_v57 = vshll.u32 %v365_v46, %v372_v52 }
 0x1fc   :  { %v375_v58 = vshrl.u32 %v357_v53, %v373_v55  ;;  %v378_v59 = vadd.s32 127, %v377_v56 }
 0x1fe   :  { %v376_v60 = vor.u32 %v375_v58, %v374_v57  ;;  %v379_v61 = vshll.u32 %v378_v59, 23 }
 0x200   :  { %v380_v62 = vor.u32 4788187, %v379_v61  ;;  %v383_v0 = vcvt.s32.f32 %v376_v60 }
 0x202   :  { %v381_v63 = vand.u32 2147483647, %v380_v62 }
 0x204   :  { %v384_v1 = vmul.f32 %v383_v0, %v381_v63 }
 0x206   :  { %v385_v3 = vxor.u32 2147483648, %v384_v1 }
 0x208   :  { %v386_v4 = vsel %vm303_vm11, %v385_v3, %v384_v1 }
 0x209   :  { %v389_v6 = vsel %vm302_vm12, %v1025_v47, %v386_v4 }
 0x20a   :  { %778 = vcosq.f32 %v389_v6 }
 0x20b   :  { %780 = vsinq.f32 %v389_v6 }
 0x214   :  { %v779_v11 = vpop.eup %778 }
 0x215   :  { %v781_v12 = vpop.eup %780  ;;  %v400_v13 = vxor.u32 2147483648, %v779_v11 }
 0x216   :  { %v397_v14 = vxor.u32 2147483648, %v781_v12 }
 0x217   :  { %v506_v54 = vsel %vm504_vm13, %v400_v13, %v781_v12  ;;  %v401_v15 = vsel %vm399_vm14, %v400_v13, %v781_v12 }
 0x218   :  { %v503_v16 = vsel %vm501_vm15, %v779_v11, %v397_v14  ;;  %v398_v17 = vsel %vm396_vm0, %v779_v11, %v397_v14 }
 0x219   :  { %v507_v18 = vsel %vm500_vm1, %v503_v16, %v506_v54  ;;  %v402_v19 = vsel %vm395_vm2, %v398_v17, %v401_v15 }
 0x21a   :  { %v508_v20 = vsel %vm393_vm3, nan, %v507_v18  ;;  %v403_v21 = vsel %vm393_vm3, nan, %v402_v19 }
 0x21b   :  { %509 = vst.msk [vmem:[#allocation4] sm:$0x3] %vm216_vm4, %v508_v20  ;;  %404 = vst.msk [vmem:[#allocation2] sm:$0x3] %vm216_vm4, %v403_v21 }
 0x21c   :  { %815 = shalt.err (!%p812_p12)
}
 0x21d   :  { %s816_s15 = scalar_lea.hbm %s1121_s10, 32 }
 0x21e   :  { %p817_p13 = scmp.ne.s32.totalorder %s1121_s10, %s816_s15  ;;  %p820_p0 = scmp.lt.u32.totalorder %s816_s15, %s1121_s10 }
 0x220   :  { %p822_p1 = pnand %p820_p0, %p817_p13 }
 0x222   :  { %825 = shalt.err (!%p822_p1)
}
 0x223   :  { %613 = dma.vmem_to_hbm [thread:$0]  %s611_s28, 32, %s1121_s10, [#allocation5]  }
 0x224   :  { %s826_s4 = scalar_lea.vmem %s1059_s30, 32  ;;  %p831_p3 = scmp.lt.s32.totalorder %s1059_s30, %s1059_s30 }
 0x225   :  { %p827_p2 = scmp.ne.s32.totalorder %s1059_s30, %s826_s4  ;;  %p832_p4 = scmp.lt.s32.totalorder %s826_s4, %s826_s4 }
 0x227   :  { %p833_p5 = por %p832_p4, %p831_p3 }
 0x229   :  { %p834_p6 = pnand %p833_p5, %p827_p2 }
 0x22b   :  { %837 = shalt.err (!%p834_p6)
}
 0x22c   :  { %s838_s20 = scalar_lea.hbm %s1120_s9, 32 }
 0x22d   :  { %p839_p7 = scmp.ne.s32.totalorder %s1120_s9, %s838_s20  ;;  %p842_p8 = scmp.lt.u32.totalorder %s838_s20, %s1120_s9 }
 0x22f   :  { %p844_p9 = pnand %p842_p8, %p839_p7 }
 0x231   :  { %847 = shalt.err (!%p844_p9)
}
 0x232   :  { %603 = dma.vmem_to_hbm [thread:$0]  %s1059_s30, 32, %s1120_s9, [#allocation3]  }
 0x233   :  { %s848_s25 = scalar_lea.vmem %s1063_s13, 32  ;;  %p853_p11 = scmp.lt.s32.totalorder %s1063_s13, %s1063_s13 }
 0x234   :  { %p849_p10 = scmp.ne.s32.totalorder %s1063_s13, %s848_s25  ;;  %p854_p12 = scmp.lt.s32.totalorder %s848_s25, %s848_s25 }
 0x236   :  { %p855_p13 = por %p854_p12, %p853_p11 }
 0x238   :  { %p856_p0 = pnand %p855_p13, %p849_p10 }
 0x23a   :  { %859 = shalt.err (!%p856_p0)
}
 0x23b   :  { %s860_s12 = scalar_lea.hbm %s1122_s11, 32 }
 0x23c   :  { %p861_p1 = scmp.ne.s32.totalorder %s1122_s11, %s860_s12  ;;  %p864_p2 = scmp.lt.u32.totalorder %s860_s12, %s1122_s11 }
 0x23e   :  { %p866_p3 = pnand %p864_p2, %p861_p1 }
 0x240   :  { %869 = shalt.err (!%p866_p3)
}
 0x241   :  { %623 = dma.vmem_to_hbm [thread:$0]  %s1063_s13, 32, %s1122_s11, [#allocation5]  }
 0x242   :  { %870 = dma.done.wait [#allocation3], 32  }
 0x243   :  { %871 = vsyncadd [#allocation3], 4294967264 }
 0x244   :  { %872 = dma.done.wait [#allocation5], 64  }
 0x245   :  { %873 = vsyncadd [#allocation5], 4294967232 }
 0x246   :  { %874 = dma.done.wait [#allocation8], 32  }
 0x247   :  { %875 = vsyncadd [#allocation8], 4294967264 }
 0x248   :  { %646 = vsyncpa [#allocation3], 1 }
 0x249   :  { %647 = vsyncpa [#allocation5], 1 }
 0x24a   :  { %648 = vsyncpa [#allocation8], 1 }

</bundles_post_ra>
